<compile_context>
chip_gen: v7x
topology: tpu7x:2x2x1
jax: 0.10.0
libtpu: 0.0.40
codegen_flags: <defaults>
</compile_context>

<pallas_src>
import jax
import jax.numpy as jnp
from jax.experimental import pallas as pl
from jax.experimental.pallas import tpu as pltpu


def _instance_norm_kernel(x_ref, w_ref, b_ref, o_ref):
    x = x_ref[...].astype(jnp.float32)                 # (r_blk, L)
    n = x.shape[-1]

    # Per-row mean (XLU reduction), then centered two-pass variance.
    mean = jnp.sum(x, axis=-1, keepdims=True) * (1.0 / n)
    d = x - mean
    # Unbiased variance.  NOTE: for H*W == 1 torch.std() returns NaN; the
    # max(n-1, 1) guard keeps this kernel finite instead (intentional).
    var = jnp.sum(d * d, axis=-1, keepdims=True) * (1.0 / max(n - 1, 1))
    std = jnp.sqrt(var) + 1e-5                         # eps AFTER sqrt (torch idiom)

    inv = pl.reciprocal(std, approx=False)             # per-row only; exact f32
    scale = w_ref[...].astype(jnp.float32) * inv       # (r_blk, 1)
    o_ref[...] = (d * scale + b_ref[...].astype(jnp.float32)).astype(o_ref.dtype)


def _vmem_capacity_bytes(default=64 << 20):
    try:
        info = pltpu.get_tpu_info()
        cap = getattr(info, "vmem_capacity_bytes", None)
        if cap:
            return int(cap)
    except Exception:
        pass
    return default


def instance_norm_2d(x, weight, bias, *, target_block_bytes=None, min_grid_steps=4):
    """x: (N, C, H, W); weight, bias: (C,). Returns (N, C, H, W)."""
    N, C, H, W = x.shape
    R, L = N * C, H * W
    itemsize = jnp.dtype(x.dtype).itemsize

    # Generation-aware budgets (128 MiB physical VMEM on v5e/v6e, 64 MiB v7x).
    vmem_cap = _vmem_capacity_bytes()
    vmem_budget = min(vmem_cap // 2, 64 << 20)          # scoped budget for this call
    if target_block_bytes is None:
        target_block_bytes = (4 << 20) if vmem_cap >= (96 << 20) else (2 << 20)
    # Double-buffered in + out ~= 4x tile must fit the budget.
    target_block_bytes = max(1, min(target_block_bytes, vmem_budget // 4))

    # dtype-dependent sublane multiple: f32 -> 8, bf16 -> 16, int8/fp8 -> 32.
    sub_mult = {1: 32, 2: 16, 4: 8}.get(itemsize, 8)

    rows_budget = max(
        sub_mult,
        (target_block_bytes // max(1, L * itemsize)) // sub_mult * sub_mult,
    )
    # Give the grid >= min_grid_steps steps when R permits (v7x megacore +
    # pipeline prologue/epilogue hiding).
    rows_for_steps = max(
        sub_mult, pl.cdiv(pl.cdiv(R, min_grid_steps), sub_mult) * sub_mult
    )
    r_blk = min(rows_budget, rows_for_steps, pl.cdiv(R, sub_mult) * sub_mult)
    grid = pl.cdiv(R, r_blk)

    # TODO(synk): if even the minimum sub_mult-row tile (4x double-buffered)
    # exceeds the scoped-VMEM budget (huge H*W, esp. v5e's 16 MiB default),
    # split L across a second 'arbitrary' grid axis with partial-stat scratch.
    tile_bytes = r_blk * L * itemsize
    needed = 4 * tile_bytes + 8 * r_blk * itemsize + (1 << 20)
    vmem_limit = int(max(min(vmem_budget, max(needed, 32 << 20)), needed))

    # (N*C, H*W) view is free for contiguous NCHW; per-row params are tiny.
    x2 = x.reshape(R, L)
    w_rows = jnp.tile(weight, N).reshape(R, 1)           # row r = n*C + c -> weight[c]
    b_rows = jnp.tile(bias, N).reshape(R, 1)

    cost = pl.CostEstimate(
        flops=5 * R * L,
        transcendentals=2 * R,
        bytes_accessed=2 * R * L * itemsize + 4 * R * itemsize,
    )

    out = pl.pallas_call(
        _instance_norm_kernel,
        out_shape=jax.ShapeDtypeStruct((R, L), x.dtype),
        grid_spec=pl.GridSpec(
            grid=(grid,),
            in_specs=[
                pl.BlockSpec((r_blk, L), lambda i: (i, 0)),   # x rows (lane-dense)
                pl.BlockSpec((r_blk, 1), lambda i: (i, 0)),   # per-row weight
                pl.BlockSpec((r_blk, 1), lambda i: (i, 0)),   # per-row bias
            ],
            out_specs=pl.BlockSpec((r_blk, L), lambda i: (i, 0)),
        ),
        compiler_params=pltpu.CompilerParams(
            dimension_semantics=("parallel",),
            vmem_limit_bytes=vmem_limit,
        ),
        cost_estimate=cost,
    )(x2, w_rows, b_rows)

    return out.reshape(N, C, H, W)


def instance_norm_2d_ref(x, weight, bias):
    # Pure-JAX reference matching the PyTorch module (unbiased std, eps after sqrt).
    x32 = x.astype(jnp.float32)
    mean = jnp.mean(x32, axis=(2, 3), keepdims=True)
    var = jnp.sum((x32 - mean) ** 2, axis=(2, 3), keepdims=True) / (
        x.shape[2] * x.shape[3] - 1
    )
    std = jnp.sqrt(var) + 1e-5
    xn = (x32 - mean) / std
    return (weight[None, :, None, None] * xn + bias[None, :, None, None]).astype(x.dtype)


if __name__ == "__main__":
    key = jax.random.PRNGKey(0)
    k_x, k_w, k_x2, k_w2 = jax.random.split(key, 4)

    # Primary demo shape (with a DC offset to exercise the two-pass variance).
    N, C, H, W = 2, 4, 16, 16
    x = jax.random.normal(k_x, (N, C, H, W), dtype=jnp.float32) * 2.0 + 3.0
    # Parameter shapes from __init__: weight (C,), bias (C,).
    # (nn.init.xavier_uniform_ on a 1-D tensor is ill-defined; deterministic
    #  random init used instead.)
    weight = jax.random.normal(k_w, (C,), dtype=jnp.float32)
    bias = jnp.full((C,), 0.25, dtype=jnp.float32)

    out = jax.block_until_ready(instance_norm_2d(x, weight, bias))
    ref = instance_norm_2d_ref(x, weight, bias)
    assert out.shape == (N, C, H, W)
    assert jnp.max(jnp.abs(out - ref)) < 1e-4

    # Ragged row count (N*C = 15) and non-128-multiple spatial size (L = 240):
    # exercises the clipped final grid block and masked lane stores, with no
    # wrapper-side pad/slice copies.
    N2, C2, H2, W2 = 3, 5, 20, 12
    x2 = jax.random.normal(k_x2, (N2, C2, H2, W2), dtype=jnp.float32) - 1.5
    w2 = jax.random.normal(k_w2, (C2,), dtype=jnp.float32)
    b2 = jnp.zeros((C2,), dtype=jnp.float32)
    out2 = jax.block_until_ready(instance_norm_2d(x2, w2, b2))
    ref2 = instance_norm_2d_ref(x2, w2, b2)
    assert out2.shape == (N2, C2, H2, W2)
    assert jnp.max(jnp.abs(out2 - ref2)) < 1e-4

    print("KERNEL_OK")
</pallas_src>

<mosaic_0001>
module attributes {stable_mosaic.version = 11 : i64} {
  func.func @_instance_norm_kernel(%arg0: i32, %arg1: memref<8x256xf32, #tpu.memory_space<vmem>>, %arg2: memref<8x1xf32, #tpu.memory_space<vmem>>, %arg3: memref<8x1xf32, #tpu.memory_space<vmem>>, %arg4: memref<8x256xf32, #tpu.memory_space<vmem>>) attributes {dimension_semantics = [#tpu.dimension_semantics<parallel>], iteration_bounds = array<i64: 1>, scalar_prefetch = 0 : i64, scratch_operands = 0 : i64, tpu.core_type = #tpu.core_type<tc>, window_params = [{transform_indices = @transform_0, window_bounds = array<i64: 8, 256>}, {transform_indices = @transform_1, window_bounds = array<i64: 8, 1>}, {transform_indices = @transform_2, window_bounds = array<i64: 8, 1>}, {transform_indices = @transform_3, window_bounds = array<i64: 8, 256>}]} {
    %c0 = arith.constant 0 : index
    %c0_0 = arith.constant 0 : index
    %0 = vector.load %arg1[%c0, %c0_0] : memref<8x256xf32, #tpu.memory_space<vmem>>, vector<8x256xf32>
    %cst = arith.constant dense<0.000000e+00> : vector<8xf32>
    %1 = vector.multi_reduction <add>, %0, %cst [1] : vector<8x256xf32> to vector<8xf32>
    %2 = vector.shape_cast %1 : vector<8xf32> to vector<8x1xf32>
    %cst_1 = arith.constant 3.906250e-03 : f32
    %3 = vector.broadcast %cst_1 : f32 to vector<8x1xf32>
    %4 = arith.mulf %2, %3 : vector<8x1xf32>
    %5 = vector.broadcast %4 : vector<8x1xf32> to vector<8x256xf32>
    %6 = arith.subf %0, %5 : vector<8x256xf32>
    %7 = arith.mulf %6, %6 : vector<8x256xf32>
    %cst_2 = arith.constant dense<0.000000e+00> : vector<8xf32>
    %8 = vector.multi_reduction <add>, %7, %cst_2 [1] : vector<8x256xf32> to vector<8xf32>
    %9 = vector.shape_cast %8 : vector<8xf32> to vector<8x1xf32>
    %cst_3 = arith.constant 0.00392156886 : f32
    %10 = vector.broadcast %cst_3 : f32 to vector<8x1xf32>
    %11 = arith.mulf %9, %10 : vector<8x1xf32>
    %12 = math.sqrt %11 : vector<8x1xf32>
    %cst_4 = arith.constant 9.99999974E-6 : f32
    %13 = vector.broadcast %cst_4 : f32 to vector<8x1xf32>
    %14 = arith.addf %12, %13 : vector<8x1xf32>
    %15 = tpu.reciprocal %14 : vector<8x1xf32> -> vector<8x1xf32>
    %c0_5 = arith.constant 0 : index
    %c0_6 = arith.constant 0 : index
    %16 = vector.load %arg2[%c0_5, %c0_6] : memref<8x1xf32, #tpu.memory_space<vmem>>, vector<8x1xf32>
    %17 = arith.mulf %16, %15 : vector<8x1xf32>
    %18 = vector.broadcast %17 : vector<8x1xf32> to vector<8x256xf32>
    %19 = arith.mulf %6, %18 : vector<8x256xf32>
    %c0_7 = arith.constant 0 : index
    %c0_8 = arith.constant 0 : index
    %20 = vector.load %arg3[%c0_7, %c0_8] : memref<8x1xf32, #tpu.memory_space<vmem>>, vector<8x1xf32>
    %21 = vector.broadcast %20 : vector<8x1xf32> to vector<8x256xf32>
    %22 = arith.addf %19, %21 : vector<8x256xf32>
    %c0_9 = arith.constant 0 : index
    %c0_10 = arith.constant 0 : index
    %23 = vector.load %arg4[%c0_9, %c0_10] : memref<8x256xf32, #tpu.memory_space<vmem>>, vector<8x256xf32>
    tpu.vector_store %arg4[%c0_9, %c0_10], %22 {strides = array<i32>} : memref<8x256xf32, #tpu.memory_space<vmem>>, vector<8x256xf32>,
    return
  }
  func.func @transform_0(%arg0: i32) -> (i32, i32) {
    %c0_i32 = arith.constant 0 : i32
    %c0_i32_0 = arith.constant 0 : i32
    return %arg0, %c0_i32 : i32, i32
  }
  func.func @transform_1(%arg0: i32) -> (i32, i32) {
    %c0_i32 = arith.constant 0 : i32
    %c0_i32_0 = arith.constant 0 : i32
    return %arg0, %c0_i32 : i32, i32
  }
  func.func @transform_2(%arg0: i32) -> (i32, i32) {
    %c0_i32 = arith.constant 0 : i32
    %c0_i32_0 = arith.constant 0 : i32
    return %arg0, %c0_i32 : i32, i32
  }
  func.func @transform_3(%arg0: i32) -> (i32, i32) {
    %c0_i32 = arith.constant 0 : i32
    %c0_i32_0 = arith.constant 0 : i32
    return %arg0, %c0_i32 : i32, i32
  }
}

</mosaic_0001>

<bundles_post_ra>
// kernel: tpu_custom_call.1
= control target key start
LH: loop header
LB: loop body
LE: loop exit
PB: predicated region body
PF: predicated region fallthrough
CT: control target
= control target key end

     0   :  { %s149_s0 = inlined_call_operand.vmem [shape: f32[8,256], index: 0, kind: input, shape index: {}]   ;;  %s150_s1 = inlined_call_operand.vmem [shape: f32[8,1], index: 1, kind: input, shape index: {}]   ;;  %s151_s2 = inlined_call_operand.vmem [shape: f32[8,1], index: 2, kind: input, shape index: {}]   ;;  %s152_s3 = inlined_call_operand.hbm [shape: f32[8,256], index: 3, kind: output, shape index: {}]  }
   0x1   :  { %v15_v0 = vld [vmem:[%s149_s0] sm:$0xff]  ;;  %v16_v1 = vld [vmem:[%s149_s0 + $0x8] sm:$0xff] }
   0x2   :  { %8 = vsyncpa [#allocation3], 0  ;;  %v17_v2 = vadd.f32 %v16_v1, %v15_v0  ;;  %v103_v10 = vmov 0   ;;  %v38_v19 = vld [vmem:[%s150_s1] sm:$0xff]  ;;  %s104_s19 = smov [#allocation2]  }
   0x3   :  { %73 = vset.pattern.permute.xlu1 %v103_v10  ;;  %74 = vset.pattern.permute.xlu0 %v103_v10  ;;  %v47_v22 = vld [vmem:[%s151_s2] sm:$0xff]  ;;  %s63_s20 = sshll.u32 %s104_s19, 4  ;;  %s64_s20 = int_to_ptr.vmem [resolvable:$true] %s63_s20 }
   0x4   :  { %18 = vadd.xlane.f32.xlu0 %v17_v2  ;;  %s79_s1 = scalar_lea.vmem %s64_s20, 256  ;;  %p84_p1 = scmp.lt.s32.totalorder %s64_s20, %s64_s20 }
   0x5   :  { %p80_p0 = scmp.ne.s32.totalorder %s64_s20, %s79_s1  ;;  %p85_p2 = scmp.lt.s32.totalorder %s79_s1, %s79_s1 }
   0x7   :  { %p86_p3 = por %p85_p2, %p84_p1 }
   0x9   :  { %p87_p4 = pnand %p86_p3, %p80_p0 }
  0x91   :  { %v19_v3 = vpop.xlane.xlu0 %18 }
  0x92   :  { %v20_v4 = vmul.f32 0.00390625, %v19_v3 }
  0x94   :  { %v21_v5 = vsub.f32 %v15_v0, %v20_v4  ;;  %v22_v6 = vsub.f32 %v16_v1, %v20_v4 }
  0x96   :  { %v23_v7 = vmul.f32 %v21_v5, %v21_v5  ;;  %v24_v8 = vmul.f32 %v22_v6, %v22_v6 }
  0x98   :  { %v25_v9 = vadd.f32 %v24_v8, %v23_v7 }
  0x9a   :  { %26 = vadd.xlane.f32.xlu0 %v25_v9 }
 0x127   :  { %v27_v11 = vpop.xlane.xlu0 %26 }
 0x128   :  { %v28_v12 = vmul.f32 0.003921569, %v27_v11 }
 0x12a   :  { %75 = vrsqrt.f32 %v28_v12  ;;  %vm31_vm0 = vcmp.eq.f32.partialorder %v28_v12, inf  ;;  %v34_v15 = vand.u32 2147483648, %v28_v12  ;;  %vm33_vm1 = vcmp.eq.f32.partialorder %v28_v12, 0.0 }
 0x134   :  { %v76_v13 = vpop.eup %75 }
 0x135   :  { %v30_v14 = vmul.f32 %v76_v13, %v28_v12 }
 0x137   :  { %v32_v16 = vsel %vm31_vm0, %v28_v12, %v30_v14 }
 0x138   :  { %v35_v17 = vsel %vm33_vm1, %v34_v15, %v32_v16 }
 0x139   :  { %v36_v18 = vadd.f32 1e-05, %v35_v17 }
 0x13b   :  { %77 = vrcp.f32 %v36_v18 }
 0x145   :  { %v78_v20 = vpop.eup %77 }
 0x146   :  { %v39_v21 = vmul.f32 %v78_v20, %v38_v19 }
 0x148   :  { %42 = vperm.xlu1 %73, %v39_v21  }
 0x14c   :  { %50 = vperm.xlu1 %73, %v47_v22  }
 0x1c7   :  { %v43_v23 = vpop.permute.xlu1 %42 }
 0x1c8   :  { %v45_v24 = vmul.f32 %v43_v23, %v21_v5  ;;  %v46_v25 = vmul.f32 %v43_v23, %v22_v6 }
 0x1cb   :  { %v51_v26 = vpop.permute.xlu1 %50 }
 0x1cc   :  { %v53_v27 = vadd.f32 %v51_v26, %v45_v24  ;;  %v54_v28 = vadd.f32 %v51_v26, %v46_v25 }
 0x1ce   :  { %55 = vst [vmem:[#allocation2] sm:$0xff] %v53_v27  ;;  %56 = vst [vmem:[#allocation2 + $0x8] sm:$0xff] %v54_v28 }
 0x1cf   :  { %90 = shalt.err (!%p87_p4)
}
 0x1d0   :  { %s91_s22 = scalar_lea.hbm %s152_s3, 256 }
 0x1d1   :  { %p92_p5 = scmp.ne.s32.totalorder %s152_s3, %s91_s22  ;;  %p95_p6 = scmp.lt.u32.totalorder %s91_s22, %s152_s3 }
 0x1d3   :  { %p97_p7 = pnand %p95_p6, %p92_p5 }
 0x1d5   :  { %100 = shalt.err (!%p97_p7)
}
 0x1d6   :  { %66 = dma.vmem_to_hbm [thread:$0]  %s64_s20, 256, %s152_s3, [#allocation3]  }
 0x1d7   :  { %101 = dma.done.wait [#allocation3], 256  }
 0x1d8   :  { %102 = vsyncadd [#allocation3], 4294967040 }
 0x1d9   :  { %70 = vsyncpa [#allocation3], 1 }

</bundles_post_ra>
